<compile_context>
chip_gen: v5e
topology: v5e:2x2
jax: 0.10.0
libtpu: 0.0.40
codegen_flags: <defaults>
</compile_context>

<pallas_src>
import jax
import jax.numpy as jnp
from jax.experimental import pallas as pl
from jax.experimental.pallas import tpu as pltpu


def critic_kernel(s_ref, a_ref, w1s_ref, w1a_ref, w2_ref, vecs_ref, b3_ref, o_ref):
    # s_ref: (TB, S), a_ref: (TB, A)        batch-major activation tiles
    # w1s_ref: (H, S), w1a_ref: (H, A), w2_ref: (H, H)   transposed weights
    # vecs_ref: (H, 3) columns = [b1 | b2 | w3];  b3_ref: (1,) scalar in SMEM
    # o_ref: (1, 1, TB)                      lane-dense output tile
    dn = (((1,), (1,)), ((), ()))  # contract on the feature axis of both operands
    # Layer 1 (fused concat): s@W1_s + a@W1_a, computed feature-major -> (H, TB)
    h1 = jax.lax.dot_general(w1s_ref[...], s_ref[...], dn,
                             preferred_element_type=jnp.float32)
    h1 = h1 + jax.lax.dot_general(w1a_ref[...], a_ref[...], dn,
                                  preferred_element_type=jnp.float32)
    h1 = jnp.maximum(h1 + vecs_ref[:, 0:1], 0.0)
    # Layer 2: (H, H) x (H, TB) -> (H, TB); N = TB keeps the MXU output lanes full.
    h2 = jnp.dot(w2_ref[...], h1, preferred_element_type=jnp.float32)
    h2 = jnp.maximum(h2 + vecs_ref[:, 1:2], 0.0)
    # Layer 3 (out_features == 1): VPU multiply + sublane reduce -> (1, TB).
    out = jnp.sum(h2 * vecs_ref[:, 2:3], axis=0, keepdims=True) + b3_ref[0]
    o_ref[0] = out.astype(o_ref.dtype)


def _round_up(x, m):
    return (x + m - 1) // m * m


def _choose_batch_tile(B, tile_cap):
    """Batch tile TB: multiple of 8, <= B (blocks never exceed the array), close to
    the 8-rounded batch (or ~half of it for large batches so the parallel grid axis
    has >= 2 steps for v7x megacore). Prefers a divisor of round_up(B, 8) so the
    ragged tail of the last tile is < 8 rows."""
    if B < 8:
        return B                       # single full-array block (block == array dim)
    B8 = _round_up(B, 8)
    target = B8 if B8 < 512 else _round_up((B8 + 1) // 2, 8)
    target = min(target, tile_cap, (B // 8) * 8)
    tb = target
    while tb > 8 and B8 % tb != 0:
        tb -= 8
    if tb < target // 2:               # exact divisor would force tiny tiles:
        tb = target                    # accept a bigger ragged tail instead.
    return max(tb, 8)


def critic_forward(state, action, params, *, tile_b=2048):
    """Pallas forward of Critic(state, action). params = (w1, b1, w2, b2, w3, b3),
    weights stored [in_features, out_features], biases [1, out_features]."""
    w1, b1, w2, b2, w3, b3 = params
    B, S = state.shape
    A = action.shape[1]
    H = w1.shape[1]

    # Weight-side prep (tiny; constant-folded under jit). Split W1 so no XLA-side
    # concat of [state|action] is needed; transpose so the kernel is feature-major.
    w1s_t = w1[:S].T                    # (H, S)
    w1a_t = w1[S:].T                    # (H, A)
    w2_t = w2.T                         # (H, H)
    vecs = jnp.stack([b1.reshape(H), b2.reshape(H), w3.reshape(H)], axis=1)  # (H, 3)
    b3_s = b3.reshape(1)                # (1,) -> SMEM scalar

    TB = _choose_batch_tile(B, tile_b)
    nb = -(-B // TB)                    # cdiv: nb * TB >= B, last tile may be ragged

    def resident(arr):                  # same block every step -> stays in VMEM
        nd = arr.ndim
        return pl.BlockSpec(arr.shape, lambda i, _nd=nd: (0,) * _nd)

    flops = 2 * nb * TB * ((S + A) * H + H * H + H)
    bytes_accessed = 4 * (nb * TB * (S + A + 1) + (S + A) * H + H * H + 3 * H + 1)

    out = pl.pallas_call(
        critic_kernel,
        out_shape=jax.ShapeDtypeStruct((nb, 1, TB), jnp.float32),
        grid=(nb,),
        in_specs=[
            pl.BlockSpec((TB, S), lambda i: (i, 0)),     # state tile (batch-major)
            pl.BlockSpec((TB, A), lambda i: (i, 0)),     # action tile
            resident(w1s_t), resident(w1a_t), resident(w2_t), resident(vecs),
            pl.BlockSpec(memory_space=pltpu.MemorySpace.SMEM),   # b3 scalar
        ],
        out_specs=pl.BlockSpec((1, 1, TB), lambda i: (i, 0, 0)),
        compiler_params=pltpu.CompilerParams(
            dimension_semantics=("parallel",)),          # megacore split on v7x
        cost_estimate=pl.CostEstimate(
            flops=flops, transcendentals=0, bytes_accessed=bytes_accessed),
    )(state, action, w1s_t, w1a_t, w2_t, vecs, b3_s)
    # Lane-dense slab -> (B, 1); rows past B (ragged-tail garbage) are dropped.
    return out.reshape(nb * TB)[:B].reshape(B, 1)


def init_linear(key, in_features, out_features):
    """PyTorch nn.Linear default init: U(-1/sqrt(in), 1/sqrt(in))."""
    kw, kb = jax.random.split(key)
    bound = 1.0 / jnp.sqrt(jnp.float32(in_features))
    # stored as [in, out] so the reference computes x @ W + b
    w = jax.random.uniform(kw, (in_features, out_features), jnp.float32, -bound, bound)
    b = jax.random.uniform(kb, (1, out_features), jnp.float32, -bound, bound)
    return w, b


def _reference(state, action, params):
    w1, b1, w2, b2, w3, b3 = params
    x = jnp.concatenate([state, action], axis=1)
    h = jnp.maximum(x @ w1 + b1, 0.0)
    h = jnp.maximum(h @ w2 + b2, 0.0)
    return h @ w3 + b3


if __name__ == "__main__":
    state_dim = 24
    action_dim = 8
    input_size = state_dim + action_dim   # 32
    hidden_size = 32
    output_size = 1

    root = jax.random.PRNGKey(0)
    k_s, k_a, k1, k2, k3, k_s2, k_a2 = jax.random.split(root, 7)

    w1, b1 = init_linear(k1, input_size, hidden_size)
    w2, b2 = init_linear(k2, hidden_size, hidden_size)
    w3, b3 = init_linear(k3, hidden_size, output_size)
    params = (w1, b1, w2, b2, w3, b3)

    # Small inference-style batch (single full-array block, no padding / raggedness).
    batch = 8
    state = jax.random.normal(k_s, (batch, state_dim), jnp.float32)
    action = jax.random.normal(k_a, (batch, action_dim), jnp.float32)
    out = critic_forward(state, action, params)
    jax.block_until_ready(out)
    ref = _reference(state, action, params)
    assert out.shape == (batch, output_size)
    assert jnp.allclose(out, ref, atol=1e-4, rtol=1e-4)

    # Training-style batch exercising the gridded path with a ragged last tile
    # (B=300 -> TB=152, grid=(2,), 4 out-of-bounds rows sliced off; no jnp.pad copy).
    batch2 = 300
    state2 = jax.random.normal(k_s2, (batch2, state_dim), jnp.float32)
    action2 = jax.random.normal(k_a2, (batch2, action_dim), jnp.float32)
    out2 = critic_forward(state2, action2, params)
    jax.block_until_ready(out2)
    ref2 = _reference(state2, action2, params)
    assert out2.shape == (batch2, output_size)
    assert jnp.allclose(out2, ref2, atol=1e-4, rtol=1e-4)

    print("KERNEL_OK")
</pallas_src>

<mosaic_0001>
module attributes {stable_mosaic.version = 11 : i64} {
  func.func @critic_kernel(%arg0: i32, %arg1: memref<8x24xf32, #tpu.memory_space<vmem>>, %arg2: memref<8x8xf32, #tpu.memory_space<vmem>>, %arg3: memref<32x24xf32, #tpu.memory_space<vmem>>, %arg4: memref<32x8xf32, #tpu.memory_space<vmem>>, %arg5: memref<32x32xf32, #tpu.memory_space<vmem>>, %arg6: memref<32x3xf32, #tpu.memory_space<vmem>>, %arg7: memref<1xf32, #tpu.memory_space<smem>>, %arg8: memref<1x1x8xf32, #tpu.memory_space<vmem>>) attributes {dimension_semantics = [#tpu.dimension_semantics<parallel>], iteration_bounds = array<i64: 1>, scalar_prefetch = 0 : i64, scratch_operands = 0 : i64, tpu.core_type = #tpu.core_type<tc>, window_params = [{transform_indices = @transform_0, window_bounds = array<i64: 8, 24>}, {transform_indices = @transform_1, window_bounds = array<i64: 8, 8>}, {pipeline_mode = #tpu.pipeline_mode<synchronous>, transform_indices = @transform_2, window_bounds = array<i64: 32, 24>}, {pipeline_mode = #tpu.pipeline_mode<synchronous>, transform_indices = @transform_3, window_bounds = array<i64: 32, 8>}, {pipeline_mode = #tpu.pipeline_mode<synchronous>, transform_indices = @transform_4, window_bounds = array<i64: 32, 32>}, {pipeline_mode = #tpu.pipeline_mode<synchronous>, transform_indices = @transform_5, window_bounds = array<i64: 32, 3>}, {transform_indices = @transform_6, window_bounds = array<i64: 1>}, {transform_indices = @transform_7, window_bounds = array<i64: 1, 1, 8>}]} {
    %c0 = arith.constant 0 : index
    %c0_0 = arith.constant 0 : index
    %0 = vector.load %arg3[%c0, %c0_0] : memref<32x24xf32, #tpu.memory_space<vmem>>, vector<32x24xf32>
    %c0_1 = arith.constant 0 : index
    %c0_2 = arith.constant 0 : index
    %1 = vector.load %arg1[%c0_1, %c0_2] : memref<8x24xf32, #tpu.memory_space<vmem>>, vector<8x24xf32>
    %cst = arith.constant dense<0.000000e+00> : vector<32x8xf32>
    %2 = tpu.matmul %0, %1, %cst {dimension_numbers = #tpu.dot_dimension_numbers<[1], [1], [0], [0], [0, 0, 1, 0], [], []>} : vector<32x24xf32>, vector<8x24xf32>, vector<32x8xf32> -> vector<32x8xf32>
    %c0_3 = arith.constant 0 : index
    %c0_4 = arith.constant 0 : index
    %3 = vector.load %arg4[%c0_3, %c0_4] : memref<32x8xf32, #tpu.memory_space<vmem>>, vector<32x8xf32>
    %c0_5 = arith.constant 0 : index
    %c0_6 = arith.constant 0 : index
    %4 = vector.load %arg2[%c0_5, %c0_6] : memref<8x8xf32, #tpu.memory_space<vmem>>, vector<8x8xf32>
    %cst_7 = arith.constant dense<0.000000e+00> : vector<32x8xf32>
    %5 = tpu.matmul %3, %4, %cst_7 {dimension_numbers = #tpu.dot_dimension_numbers<[1], [1], [0], [0], [0, 0, 1, 0], [], []>} : vector<32x8xf32>, vector<8x8xf32>, vector<32x8xf32> -> vector<32x8xf32>
    %6 = arith.addf %2, %5 : vector<32x8xf32>
    %c0_8 = arith.constant 0 : index
    %c0_9 = arith.constant 0 : index
    %7 = vector.load %arg6[%c0_8, %c0_9] : memref<32x3xf32, #tpu.memory_space<vmem>>, vector<32x1xf32>
    %8 = vector.broadcast %7 : vector<32x1xf32> to vector<32x8xf32>
    %9 = arith.addf %6, %8 : vector<32x8xf32>
    %cst_10 = arith.constant 0.000000e+00 : f32
    %10 = vector.broadcast %cst_10 : f32 to vector<32x8xf32>
    %11 = arith.maximumf %9, %10 : vector<32x8xf32>
    %c0_11 = arith.constant 0 : index
    %c0_12 = arith.constant 0 : index
    %12 = vector.load %arg5[%c0_11, %c0_12] : memref<32x32xf32, #tpu.memory_space<vmem>>, vector<32x32xf32>
    %cst_13 = arith.constant dense<0.000000e+00> : vector<32x8xf32>
    %13 = tpu.matmul %12, %11, %cst_13 {dimension_numbers = #tpu.dot_dimension_numbers<[1], [0], [0], [1], [0, 0, 1, 1], [], []>} : vector<32x32xf32>, vector<32x8xf32>, vector<32x8xf32> -> vector<32x8xf32>
    %c0_14 = arith.constant 0 : index
    %c1 = arith.constant 1 : index
    %14 = vector.load %arg6[%c0_14, %c1] : memref<32x3xf32, #tpu.memory_space<vmem>>, vector<32x1xf32>
    %15 = vector.broadcast %14 : vector<32x1xf32> to vector<32x8xf32>
    %16 = arith.addf %13, %15 : vector<32x8xf32>
    %cst_15 = arith.constant 0.000000e+00 : f32
    %17 = vector.broadcast %cst_15 : f32 to vector<32x8xf32>
    %18 = arith.maximumf %16, %17 : vector<32x8xf32>
    %c0_16 = arith.constant 0 : index
    %c2 = arith.constant 2 : index
    %19 = vector.load %arg6[%c0_16, %c2] : memref<32x3xf32, #tpu.memory_space<vmem>>, vector<32x1xf32>
    %20 = vector.broadcast %19 : vector<32x1xf32> to vector<32x8xf32>
    %21 = arith.mulf %18, %20 : vector<32x8xf32>
    %cst_17 = arith.constant dense<0.000000e+00> : vector<8xf32>
    %22 = vector.multi_reduction <add>, %21, %cst_17 [0] : vector<32x8xf32> to vector<8xf32>
    %23 = vector.shape_cast %22 : vector<8xf32> to vector<1x8xf32>
    %c0_18 = arith.constant 0 : index
    %24 = memref.load %arg7[%c0_18] : memref<1xf32, #tpu.memory_space<smem>>
    %25 = vector.broadcast %24 : f32 to vector<1x8xf32>
    %26 = arith.addf %23, %25 : vector<1x8xf32>
    %c0_19 = arith.constant 0 : index
    %c0_20 = arith.constant 0 : index
    %c0_21 = arith.constant 0 : index
    %27 = vector.load %arg8[%c0_19, %c0_20, %c0_21] : memref<1x1x8xf32, #tpu.memory_space<vmem>>, vector<1x1x8xf32>
    %28 = vector.shape_cast %27 : vector<1x1x8xf32> to vector<1x8xf32>
    %29 = vector.shape_cast %26 : vector<1x8xf32> to vector<1x1x8xf32>
    tpu.vector_store %arg8[%c0_19, %c0_20, %c0_21], %29 {strides = array<i32>} : memref<1x1x8xf32, #tpu.memory_space<vmem>>, vector<1x1x8xf32>,
    return
  }
  func.func @transform_0(%arg0: i32) -> (i32, i32) {
    %c0_i32 = arith.constant 0 : i32
    %c0_i32_0 = arith.constant 0 : i32
    return %arg0, %c0_i32 : i32, i32
  }
  func.func @transform_1(%arg0: i32) -> (i32, i32) {
    %c0_i32 = arith.constant 0 : i32
    %c0_i32_0 = arith.constant 0 : i32
    return %arg0, %c0_i32 : i32, i32
  }
  func.func @transform_2(%arg0: i32) -> (i32, i32) {
    %c0_i32 = arith.constant 0 : i32
    %c0_i32_0 = arith.constant 0 : i32
    %c0_i32_1 = arith.constant 0 : i32
    return %c0_i32, %c0_i32_0 : i32, i32
  }
  func.func @transform_3(%arg0: i32) -> (i32, i32) {
    %c0_i32 = arith.constant 0 : i32
    %c0_i32_0 = arith.constant 0 : i32
    %c0_i32_1 = arith.constant 0 : i32
    return %c0_i32, %c0_i32_0 : i32, i32
  }
  func.func @transform_4(%arg0: i32) -> (i32, i32) {
    %c0_i32 = arith.constant 0 : i32
    %c0_i32_0 = arith.constant 0 : i32
    %c0_i32_1 = arith.constant 0 : i32
    return %c0_i32, %c0_i32_0 : i32, i32
  }
  func.func @transform_5(%arg0: i32) -> (i32, i32) {
    %c0_i32 = arith.constant 0 : i32
    %c0_i32_0 = arith.constant 0 : i32
    %c0_i32_1 = arith.constant 0 : i32
    return %c0_i32, %c0_i32_0 : i32, i32
  }
  func.func @transform_6(%arg0: i32) -> i32 {
    %c0_i32 = arith.constant 0 : i32
    %c0_i32_0 = arith.constant 0 : i32
    return %c0_i32 : i32
  }
  func.func @transform_7(%arg0: i32) -> (i32, i32, i32) {
    %c0_i32 = arith.constant 0 : i32
    %c0_i32_0 = arith.constant 0 : i32
    %c0_i32_1 = arith.constant 0 : i32
    return %arg0, %c0_i32, %c0_i32_0 : i32, i32, i32
  }
}

</mosaic_0001>

<bundles_post_ra>
// kernel: tpu_custom_call.1
= control target key start
LH: loop header
LB: loop body
LE: loop exit
PB: predicated region body
PF: predicated region fallthrough
CT: control target
= control target key end

     0   :  { %vm38_vm0 = vcmask 64512   ;;  %vm83_vm1 = vcmask 195584   ;;  %v336_v5 = vmov 0   ;;  %s459_s0 = inlined_call_operand.vmem [shape: f32[8,24], index: 0, kind: input, shape index: {}]   ;;  %s460_s1 = inlined_call_operand.vmem [shape: f32[8,8], index: 1, kind: input, shape index: {}]   ;;  %s461_s2 = inlined_call_operand.vmem [shape: f32[32,24], index: 2, kind: input, shape index: {}]   ;;  %s462_s3 = inlined_call_operand.vmem [shape: f32[32,8], index: 3, kind: input, shape index: {}]   ;;  %s463_s4 = inlined_call_operand.vmem [shape: f32[32,32], index: 4, kind: input, shape index: {}]   ;;  %s464_s5 = inlined_call_operand.vmem [shape: f32[32,3], index: 5, kind: input, shape index: {}]   ;;  %s465_s6 = inlined_call_operand.<no memory space> [shape: f32[1], index: 6, kind: input, shape index: {}]   ;;  %s466_s7 = inlined_call_operand.hbm [shape: f32[1,1,8], index: 7, kind: output, shape index: {}]  }
   0x1   :  { %v37_v0 = vld [vmem:[%s460_s1] sm:$0xff]  ;;  %v129_v4 = vld [vmem:[%s464_s5 + $0x8] sm:$0xff]  ;;  %303 = vset.pattern.permute.xlu1 %v336_v5  ;;  %302 = vset.pattern.permute.xlu0 %v336_v5  ;;  %v131_v6 = vld [vmem:[%s464_s5 + $0x18] sm:$0xff] }
   0x2   :  { %v32_v1 = vld [vmem:[%s459_s0] sm:$0xff]  ;;  %280 = vmatpush.xpose.msk.msra.mxu0 %vm38_vm0, %v37_v0  ;;  %139 = vperm.xlu1 %303, %v129_v4  }
   0x3   :  { %285 = vmatpush.xpose.msk.msra.mxu1 %vm83_vm1, %v32_v1  ;;  %v33_v2 = vld [vmem:[%s462_s3] sm:$0xff] }
   0x4   :  { %v28_v3 = vld [vmem:[%s461_s2] sm:$0xff] }
   0x5   :  { %281 = vmatmul.msk.f32.vlgmr.msra.gmra.mxu0 %vm38_vm0, %v33_v2 }
   0x6   :  { %286 = vmatmul.msk.f32.vlgmr.msra.gmra.mxu1 %vm83_vm1, %v28_v3 }
   0x7   :  { %13 = vsyncpa [#allocation4], 0  ;;  %149 = vperm.xlu0 %302, %v131_v6   ;;  %v128_v7 = vld [vmem:[%s464_s5] sm:$0xff]  ;;  %v34_v8 = vld [vmem:[%s462_s3 + $0x8] sm:$0xff]  ;;  %v337_v20 = vmov 1   ;;  %v338_v28 = vmov 2  }
   0x8   :  { %v29_v9 = vld [vmem:[%s461_s2 + $0x8] sm:$0xff]  ;;  %v414_v10 = vld [vmem:[%s464_s5 + $0x10] sm:$0xff]  ;;  %v36_v13 = vld [vmem:[%s462_s3 + $0x18] sm:$0xff]  ;;  %304 = vset.pattern.permute.xlu2 %v337_v20  ;;  %vm180_vm2 = vcmask 261120   ;;  %s339_s1 = smov [#allocation3]   ;;  %s271_s12 = sshll.u32 %s466_s7, 4  ;;  %s272_s12 = int_to_ptr.hbm [resolvable:$true] %s271_s12 }
   0x9   :  { %v35_v11 = vld [vmem:[%s462_s3 + $0x10] sm:$0xff]  ;;  %v31_v14 = vld [vmem:[%s461_s2 + $0x18] sm:$0xff]  ;;  %165 = vperm.xlu2 %304, %v128_v7   ;;  %v160_v41 = vld [vmem:[%s463_s4] sm:$0xff]  ;;  %s269_s0 = sshll.u32 %s339_s1, 4  ;;  %vm262_vm3 = vcmask 57344   ;;  %s270_s0 = int_to_ptr.vmem [resolvable:$true] %s269_s0 }
   0xa   :  { %134 = vperm.xlu1 %303, %v128_v7   ;;  %v30_v12 = vld [vmem:[%s461_s2 + $0x10] sm:$0xff]  ;;  %v161_v42 = vld [vmem:[%s463_s4 + $0x8] sm:$0xff]  ;;  %v163_v44 = vld [vmem:[%s463_s4 + $0x18] sm:$0xff] }
   0xb   :  { %v162_v43 = vld [vmem:[%s463_s4 + $0x10] sm:$0xff] }
   0xd   :  { %282 = vmatmul.msk.f32.gmra.mxu0 %vm38_vm0, %v34_v8 }
   0xe   :  { %287 = vmatmul.msk.f32.gmra.mxu1 %vm83_vm1, %v29_v9 }
   0xf   :  { %144 = vperm.xlu0 %302, %v414_v10  }
  0x11   :  { %169 = vperm.xlu2 %304, %v129_v4  }
  0x12   :  { %306 = vset.pattern.permute.xlu1 %v337_v20 }
  0x13   :  { %177 = vperm.xlu1 %306, %v131_v6  }
  0x15   :  { %283 = vmatmul.msk.f32.gmra.mxu0 %vm38_vm0, %v35_v11 }
  0x16   :  { %288 = vmatmul.msk.f32.gmra.mxu1 %vm83_vm1, %v30_v12 }
  0x17   :  { %305 = vset.pattern.permute.xlu0 %v337_v20 }
  0x18   :  { %173 = vperm.xlu0 %305, %v414_v10  }
  0x19   :  { %307 = vset.pattern.permute.xlu2 %v338_v28 }
  0x1a   :  { %227 = vperm.xlu2 %307, %v128_v7  }
  0x1b   :  { %308 = vset.pattern.permute.xlu1 %v338_v28 }
  0x1c   :  { %231 = vperm.xlu1 %308, %v129_v4  }
  0x1d   :  { %284 = vmatmul.msk.f32.gmra.mxu0 %vm38_vm0, %v36_v13 }
  0x1e   :  { %289 = vmatmul.msk.f32.gmra.mxu1 %vm83_vm1, %v31_v14 }
  0x20   :  { %309 = vset.pattern.permute.xlu0 %v338_v28 }
  0x21   :  { %239 = vperm.xlu0 %309, %v131_v6  }
  0x22   :  { %235 = vperm.xlu2 %307, %v414_v10  }
  0x63   :  { %v166_v45 = vpop.permute.xlu2 %165 }
  0x6b   :  { %v170_v46 = vpop.permute.xlu2 %169 }
  0x74   :  { %v140_v23 = vpop.permute.xlu1 %139  ;;  %v228_v50 = vpop.permute.xlu2 %227 }
  0x79   :  { %v150_v19 = vpop.permute.xlu0 %149 }
  0x7c   :  { %v135_v34 = vpop.permute.xlu1 %134  ;;  %v236_v62 = vpop.permute.xlu2 %235 }
  0x81   :  { %v145_v25 = vpop.permute.xlu0 %144 }
  0x82   :  { %v71_v15 = vpop.f32.mrf.mxu0 }
  0x83   :  { %v116_v16 = vpop.f32.mrf.mxu1 }
  0x84   :  { %v117_v31 = vadd.f32 %v116_v16, %v71_v15 }
  0x85   :  { %v178_v47 = vpop.permute.xlu1 %177 }
  0x86   :  { %v152_v37 = vadd.f32 %v135_v34, %v117_v31 }
  0x88   :  { %v156_v40 = vmax.f32 %v152_v37, 0.0 }
  0x8a   :  { %v74_v17 = vpop.f32.mrf.mxu0  ;;  %v174_v53 = vpop.permute.xlu0 %173 }
  0x8b   :  { %v119_v18 = vpop.f32.mrf.mxu1 }
  0x8c   :  { %v120_v29 = vadd.f32 %v119_v18, %v74_v17  ;;  %v260_v17 = vstv %s465_s6 }
  0x8e   :  { %v153_v36 = vadd.f32 %v140_v23, %v120_v29  ;;  %v232_v58 = vpop.permute.xlu1 %231 }
  0x90   :  { %v157_v39 = vmax.f32 %v153_v36, 0.0 }
  0x92   :  { %v77_v21 = vpop.f32.mrf.mxu0 }
  0x93   :  { %v122_v22 = vpop.f32.mrf.mxu1  ;;  %v240_v4 = vpop.permute.xlu0 %239 }
  0x94   :  { %v123_v24 = vadd.f32 %v122_v22, %v77_v21 }
  0x96   :  { %v154_v32 = vadd.f32 %v145_v25, %v123_v24 }
  0x98   :  { %v158_v38 = vmax.f32 %v154_v32, 0.0 }
  0x9a   :  { %v80_v26 = vpop.f32.mrf.mxu0 }
  0x9b   :  { %v125_v27 = vpop.f32.mrf.mxu1 }
  0x9c   :  { %v126_v30 = vadd.f32 %v125_v27, %v80_v26 }
  0x9e   :  { %v155_v33 = vadd.f32 %v150_v19, %v126_v30 }
  0xa0   :  { %v159_v35 = vmax.f32 %v155_v33, 0.0 }
  0xa2   :  { %205 = vmatpush.msra.mxu2 %v159_v35  ;;  %294 = vmatpush.msra.mxu3 %v159_v35 }
  0xa4   :  { %206 = vmatpush.msra.mxu2 %v158_v38  ;;  %295 = vmatpush.msra.mxu3 %v158_v38 }
  0xa6   :  { %207 = vmatpush.msra.mxu2 %v157_v39  ;;  %296 = vmatpush.msra.mxu3 %v157_v39 }
  0xa8   :  { %208 = vmatpush.msra.mxu2 %v156_v40  ;;  %297 = vmatpush.msra.mxu3 %v156_v40 }
  0xa9   :  { %290 = vmatmul.msk.f32.vlgmr.msra.gmra.mxu2 %vm180_vm2, %v160_v41  ;;  %291 = vmatmul.msk.f32.vlgmr.msra.gmra.mxu3 %vm180_vm2, %v161_v42 }
  0xb1   :  { %292 = vmatmul.msk.f32.gmra.mxu3 %vm180_vm2, %v162_v43 }
  0xb9   :  { %293 = vmatmul.msk.f32.gmra.mxu3 %vm180_vm2, %v163_v44 }
 0x12c   :  { %v213_v48 = vpop.f32.mrf.mxu3  ;;  %v210_v49 = vpop.f32.mrf.mxu2 }
 0x12d   :  { %v211_v51 = vadd.f32 %v210_v49, %v166_v45  ;;  %v214_v52 = vadd.f32 %v213_v48, %v170_v46 }
 0x12f   :  { %v222_v55 = vmax.f32 %v211_v51, 0.0  ;;  %v223_v56 = vmax.f32 %v214_v52, 0.0 }
 0x131   :  { %v242_v60 = vmul.f32 %v228_v50, %v222_v55  ;;  %v243_v61 = vmul.f32 %v232_v58, %v223_v56 }
 0x133   :  { %v246_v1 = vsel %vm38_vm0, %v242_v60, 0.0  ;;  %v247_v2 = vsel %vm38_vm0, %v243_v61, 0.0 }
 0x134   :  { %v216_v54 = vpop.f32.mrf.mxu3  ;;  %v248_v7 = vadd.f32 %v247_v2, %v246_v1 }
 0x135   :  { %v217_v57 = vadd.f32 %v216_v54, %v174_v53 }
 0x137   :  { %v224_v59 = vmax.f32 %v217_v57, 0.0 }
 0x139   :  { %v244_v63 = vmul.f32 %v236_v62, %v224_v59 }
 0x13b   :  { %v249_v5 = vsel %vm38_vm0, %v244_v63, 0.0 }
 0x13c   :  { %v219_v0 = vpop.f32.mrf.mxu3  ;;  %v250_v9 = vadd.f32 %v249_v5, %v248_v7 }
 0x13d   :  { %v220_v3 = vadd.f32 %v219_v0, %v178_v47 }
 0x13f   :  { %v225_v6 = vmax.f32 %v220_v3, 0.0 }
 0x141   :  { %v245_v8 = vmul.f32 %v240_v4, %v225_v6 }
 0x143   :  { %v251_v10 = vsel %vm38_vm0, %v245_v8, 0.0 }
 0x144   :  { %v252_v11 = vadd.f32 %v251_v10, %v250_v9 }
 0x146   :  { %v253_v12 = vrot.slane %v252_v11, 4 }
 0x148   :  { %v254_v13 = vadd.f32 %v253_v12, %v252_v11 }
 0x14a   :  { %v255_v14 = vrot.slane %v254_v13, 2 }
 0x14c   :  { %v256_v15 = vadd.f32 %v255_v14, %v254_v13 }
 0x14e   :  { %v257_v16 = vrot.slane %v256_v15, 1 }
 0x150   :  { %v258_v18 = vadd.f32 %v257_v16, %v256_v15 }
 0x152   :  { %v261_v19 = vadd.f32 %v260_v17, %v258_v18 }
 0x154   :  { %263 = vst.msk [vmem:[#allocation3] sm:$0x1] %vm262_vm3, %v261_v19 }
 0x155   :  { %274 = dma.vmem_to_hbm [thread:$0]  %s270_s0, 16, %s272_s12, [#allocation4]  }
 0x156   :  { %334 = dma.done.wait [#allocation4], 16  }
 0x157   :  { %335 = vsyncadd [#allocation4], 4294967280 }
 0x158   :  { %279 = vsyncpa [#allocation4], 1 }

</bundles_post_ra>
